<compile_context>
chip_gen: v7x
topology: tpu7x:2x2x1
jax: 0.10.0
libtpu: 0.0.40
codegen_flags: <defaults>
</compile_context>

<pallas_src>
import functools
import math

import jax
import jax.numpy as jnp
from jax import lax
from jax.experimental import pallas as pl
from jax.experimental.pallas import tpu as pltpu

_EPS = 1e-6

# Per-block input budget (padded VMEM bytes).  Default double buffering of
# input + output holds ~4x this at once (32 MiB) -> fits the explicit limit.
_BLOCK_BUDGET_BYTES = 8 * 1024 * 1024
_VMEM_LIMIT_BYTES = 48 * 1024 * 1024


def _round_up(n, m):
    return -(-n // m) * m


def _padded_slab_bytes(sublanes, lanes, esize):
    """VMEM footprint of one (sublanes, lanes) slab after (sub, 128) tiling."""
    sub = 32 // esize  # min sublane tile: 8 for f32, 16 for bf16, 32 for int8
    return _round_up(sublanes, sub) * _round_up(lanes, 128) * esize


# ---------------------------------------------------------------------------
# Kernels
# ---------------------------------------------------------------------------
def _norm_mid_kernel(x_ref, o_ref):
    # Block: (bt, C, lanes).  Reduce over C (sublane axis); lanes stay dense.
    # Padded lanes / padded leading rows produce garbage that is never written
    # back (Pallas masks ragged blocks); the reduction axis (C) is always fully
    # in-block, so ragged blocks are safe.  Do NOT block C across the grid
    # without adding an accumulator.
    x = x_ref[...].astype(jnp.float32)
    inv = lax.rsqrt(jnp.sum(x * x, axis=1, keepdims=True) + _EPS)
    # Re-read x_ref instead of reusing the materialized f32 copy: the kernel is
    # HBM-bound with huge vld slack, and this keeps no block-sized f32 temp
    # live for sub-f32 input dtypes.
    o_ref[...] = (x_ref[...].astype(jnp.float32) * inv).astype(o_ref.dtype)


def _norm_last_kernel(x_ref, o_ref):
    # Block: (tr, D).  Reduce over the last (lane) axis; D is always full extent.
    x = x_ref[...].astype(jnp.float32)
    inv = lax.rsqrt(jnp.sum(x * x, axis=-1, keepdims=True) + _EPS)
    o_ref[...] = (x_ref[...].astype(jnp.float32) * inv).astype(o_ref.dtype)


# ---------------------------------------------------------------------------
# pallas_call wrappers
# ---------------------------------------------------------------------------
def _normalize_mid(x3d):
    """x3d: (pre, C, post); normalize over axis 1 (kept on the sublane axis)."""
    pre, c, post = x3d.shape
    esize = x3d.dtype.itemsize
    plane_bytes = _padded_slab_bytes(c, post, esize)  # one (C, post) slab in VMEM

    if plane_bytes <= _BLOCK_BUDGET_BYTES:
        # Pack multiple `pre` rows per block.  The (8,128) rule only binds the
        # last two dims, which equal the full array extents here, so any bt is
        # legal (ragged last block handled by masking).
        bt = max(1, _BLOCK_BUDGET_BYTES // plane_bytes)
        bt = min(bt, pre)
        # v7x megacore: keep >=2 grid steps on the parallel axis when possible.
        if bt >= pre and pre >= 2:
            bt = pl.cdiv(pre, 2)
        grid = (pl.cdiv(pre, bt),)
        return pl.pallas_call(
            _norm_mid_kernel,
            out_shape=jax.ShapeDtypeStruct((pre, c, post), x3d.dtype),
            grid=grid,
            in_specs=[pl.BlockSpec((bt, c, post), lambda i: (i, 0, 0))],
            out_specs=pl.BlockSpec((bt, c, post), lambda i: (i, 0, 0)),
            compiler_params=pltpu.CompilerParams(
                dimension_semantics=("parallel",),
                vmem_limit_bytes=_VMEM_LIMIT_BYTES),
        )(x3d)

    # One `pre` slab per step; tile the lane (post) axis in multiples of 128.
    c_pad = _round_up(c, 32 // esize)
    max_lanes = max(128, ((_BLOCK_BUDGET_BYTES // (esize * c_pad)) // 128) * 128)
    # TODO(synk): for extremely large C (128-lane block already >> budget on
    # v5e's 16 MiB scoped default) a two-pass / C-grid accumulator kernel would
    # be needed; the explicit 48 MiB vmem limit covers realistic channel counts.
    tile = max_lanes
    if post <= tile:
        tile = post
        # v7x megacore: if the whole tensor is one block, split the lane axis.
        if pre == 1 and post > 128:
            tile = _round_up(pl.cdiv(post, 2), 128)
    grid = (pre, pl.cdiv(post, tile))
    return pl.pallas_call(
        _norm_mid_kernel,
        out_shape=jax.ShapeDtypeStruct((pre, c, post), x3d.dtype),
        grid=grid,
        in_specs=[pl.BlockSpec((1, c, tile), lambda b, j: (b, 0, j))],
        out_specs=pl.BlockSpec((1, c, tile), lambda b, j: (b, 0, j)),
        compiler_params=pltpu.CompilerParams(
            dimension_semantics=("parallel", "parallel"),
            vmem_limit_bytes=_VMEM_LIMIT_BYTES),
    )(x3d)


def _normalize_last(x2d):
    """x2d: (rows, D); normalize over the last (lane) axis."""
    rows, d = x2d.shape
    esize = x2d.dtype.itemsize
    row_bytes = _round_up(d, 128) * esize  # padded VMEM bytes per row
    max_rows = max(8, ((_BLOCK_BUDGET_BYTES // row_bytes) // 8) * 8)
    tr = max_rows
    if rows <= tr:
        tr = rows
        # v7x megacore: split rows into >=2 blocks when possible.
        if rows >= 16:
            tr = _round_up(pl.cdiv(rows, 2), 8)
    grid = (pl.cdiv(rows, tr),)
    # TODO(synk): for D << 128 the output is lane-sparse (masked vst); packing
    # multiple rows into the lane axis would improve lane occupancy.
    return pl.pallas_call(
        _norm_last_kernel,
        out_shape=jax.ShapeDtypeStruct((rows, d), x2d.dtype),
        grid=grid,
        in_specs=[pl.BlockSpec((tr, d), lambda i: (i, 0))],
        out_specs=pl.BlockSpec((tr, d), lambda i: (i, 0)),
        compiler_params=pltpu.CompilerParams(
            dimension_semantics=("parallel",),
            vmem_limit_bytes=_VMEM_LIMIT_BYTES),
    )(x2d)


# ---------------------------------------------------------------------------
# NopNet forward
# ---------------------------------------------------------------------------
@functools.partial(jax.jit, static_argnames=("norm_dim",))
def nopnet_forward(x, norm_dim=None):
    """Forward pass of NopNet.

    x: any-rank array (e.g. NCHW (B, C, H, W)).
    norm_dim: axis to normalize over (PyTorch `dim`), or None for identity.
    Matches: x / sqrt(sum(x**2, dim, keepdim=True) + 1e-6).
    """
    if norm_dim is None:
        return x  # identity — nothing to compute

    shape = x.shape
    axis = norm_dim % x.ndim
    # Static (Python-int) products — no tracing of shapes, no transposes.
    pre = math.prod(shape[:axis]) if axis > 0 else 1
    c = shape[axis]
    post = math.prod(shape[axis + 1:]) if axis + 1 < len(shape) else 1

    if post > 1:
        # Contiguous (free) reshape to (pre, C, post); reduce over sublane axis,
        # keeping the trailing `post` axis lane-dense.
        y = _normalize_mid(x.reshape(pre, c, post))
    else:
        # Norm axis is last: flatten rows, reduce over lanes.
        y = _normalize_last(x.reshape(pre, c))
    return y.reshape(shape)


# ---------------------------------------------------------------------------
# Reference + smoke test
# ---------------------------------------------------------------------------
def _reference(x, norm_dim):
    if norm_dim is None:
        return x
    n = jnp.sqrt(jnp.sum(x ** 2.0, axis=norm_dim, keepdims=True) + _EPS)
    return x / n


if __name__ == "__main__":
    key = jax.random.PRNGKey(0)
    x = jax.random.normal(key, (2, 4, 16, 16), dtype=jnp.float32)  # NCHW

    # norm_dim = 1 (channel normalization) — the typical NopNet use.
    y = jax.block_until_ready(nopnet_forward(x, norm_dim=1))
    assert y.shape == x.shape and y.dtype == x.dtype
    assert jnp.max(jnp.abs(y - _reference(x, 1))) < 1e-4

    # norm_dim = 2 (mid-axis, multi-row pre blocking path).
    y_mid = jax.block_until_ready(nopnet_forward(x, norm_dim=2))
    assert jnp.max(jnp.abs(y_mid - _reference(x, 2))) < 1e-4

    # norm_dim = -1 (last-axis path).
    y_last = jax.block_until_ready(nopnet_forward(x, norm_dim=-1))
    assert jnp.max(jnp.abs(y_last - _reference(x, -1))) < 1e-4

    # norm_dim = None path (identity).
    y_id = jax.block_until_ready(nopnet_forward(x, norm_dim=None))
    assert jnp.array_equal(y_id, x)

    print("KERNEL_OK")
</pallas_src>

<mosaic_0001>
module attributes {stable_mosaic.version = 11 : i64} {
  func.func @_norm_mid_kernel(%arg0: i32, %arg1: memref<1x4x256xf32, #tpu.memory_space<vmem>>, %arg2: memref<1x4x256xf32, #tpu.memory_space<vmem>>) attributes {dimension_semantics = [#tpu.dimension_semantics<parallel>], iteration_bounds = array<i64: 2>, scalar_prefetch = 0 : i64, scratch_operands = 0 : i64, tpu.core_type = #tpu.core_type<tc>, window_params = [{transform_indices = @transform_0, window_bounds = array<i64: 1, 4, 256>}, {transform_indices = @transform_1, window_bounds = array<i64: 1, 4, 256>}]} {
    %c0 = arith.constant 0 : index
    %c0_0 = arith.constant 0 : index
    %c0_1 = arith.constant 0 : index
    %0 = vector.load %arg1[%c0, %c0_0, %c0_1] : memref<1x4x256xf32, #tpu.memory_space<vmem>>, vector<1x4x256xf32>
    %1 = arith.mulf %0, %0 : vector<1x4x256xf32>
    %cst = arith.constant dense<0.000000e+00> : vector<1x256xf32>
    %2 = vector.multi_reduction <add>, %1, %cst [1] : vector<1x4x256xf32> to vector<1x256xf32>
    %3 = vector.shape_cast %2 : vector<1x256xf32> to vector<1x1x256xf32>
    %cst_2 = arith.constant 9.99999997E-7 : f32
    %4 = vector.broadcast %cst_2 : f32 to vector<1x1x256xf32>
    %5 = arith.addf %3, %4 : vector<1x1x256xf32>
    %6 = math.rsqrt %5 : vector<1x1x256xf32>
    %c0_3 = arith.constant 0 : index
    %c0_4 = arith.constant 0 : index
    %c0_5 = arith.constant 0 : index
    %7 = vector.load %arg1[%c0_3, %c0_4, %c0_5] : memref<1x4x256xf32, #tpu.memory_space<vmem>>, vector<1x4x256xf32>
    %8 = vector.broadcast %6 : vector<1x1x256xf32> to vector<1x4x256xf32>
    %9 = arith.mulf %7, %8 : vector<1x4x256xf32>
    %c0_6 = arith.constant 0 : index
    %c0_7 = arith.constant 0 : index
    %c0_8 = arith.constant 0 : index
    %10 = vector.load %arg2[%c0_6, %c0_7, %c0_8] : memref<1x4x256xf32, #tpu.memory_space<vmem>>, vector<1x4x256xf32>
    tpu.vector_store %arg2[%c0_6, %c0_7, %c0_8], %9 {strides = array<i32>} : memref<1x4x256xf32, #tpu.memory_space<vmem>>, vector<1x4x256xf32>,
    return
  }
  func.func @transform_0(%arg0: i32) -> (i32, i32, i32) {
    %c0_i32 = arith.constant 0 : i32
    %c0_i32_0 = arith.constant 0 : i32
    %c0_i32_1 = arith.constant 0 : i32
    return %arg0, %c0_i32, %c0_i32_0 : i32, i32, i32
  }
  func.func @transform_1(%arg0: i32) -> (i32, i32, i32) {
    %c0_i32 = arith.constant 0 : i32
    %c0_i32_0 = arith.constant 0 : i32
    %c0_i32_1 = arith.constant 0 : i32
    return %arg0, %c0_i32, %c0_i32_0 : i32, i32, i32
  }
}

</mosaic_0001>

<bundles_post_ra>
// kernel: nopnet_forward.1
= control target key start
LH: loop header
LB: loop body
LE: loop exit
PB: predicated region body
PF: predicated region fallthrough
CT: control target
= control target key end

     0   :  { %s245_s6 = smov 0   ;;  %s265_s0 = inlined_call_operand.vmem [shape: f32[2,4,256], index: 0, kind: input, shape index: {}]   ;;  %s266_s1 = inlined_call_operand.vmem [shape: f32[2,4,256], index: 1, kind: output, shape index: {}]  }
   0x1 LB: > { %s202_s7 = sadd.s32 4294967295, %s233_s6   ;;  %p206_p0 = scmp.ge.s32.totalorder %s233_s6, 1  ;;  %s233_s6 = sphi %s245_s6, %s11_s6  }
   0x2   : > { %p87_p1 = scmp.lt.s32.totalorder %s233_s6, 3 }
   0x4   : > { %p88_p2 = pnand %p206_p0, %p87_p1 }
   0x5   : > { %p107_p3 = scmp.lt.s32.totalorder (!%p88_p2), %s202_s7, 1  ;;  %vm122_vm0 = vcmask (!%p88_p2), 1043456  }
   0x6   : > { %91 = sbr.rel (%p88_p2) target bundleno = 52 (0x34), region = 24 }
   0xd   : > { %s268_s7 = smov (!%p107_p3, %s202_s7), 1 }
   0xe   : > { %s213_s8 = sshll.u32 %s268_s7, 3 }
   0xf   : > { %s111_s11 = scalar_lea.vmem %s265_s0, %s213_s8  ;;  %s116_s14 = scalar_lea.vmem %s266_s1, %s213_s8 }
  0x10   : > { %v117_v0 = vld [vmem:[%s111_s11] sm:$0xff] }
  0x11   : > { %v118_v1 = vmul.f32 %v117_v0, %v117_v0 }
  0x13   : > { %v120_v2 = vcombine.high %v118_v1, %v118_v1  ;;  %v123_v3 = vsel %vm122_vm0, %v118_v1, 0.0 }
  0x14   : > { %v124_v4 = vrot.slane %v123_v3, 4 }
  0x15   : > { %v130_v5 = vsel %vm122_vm0, %v120_v2, 0.0 }
  0x16   : > { %v125_v6 = vadd.f32 %v124_v4, %v123_v3  ;;  %v131_v7 = vrot.slane %v130_v5, 4 }
  0x18   : > { %v126_v8 = vrot.slane %v125_v6, 2  ;;  %v132_v9 = vadd.f32 %v131_v7, %v130_v5 }
  0x1a   : > { %v127_v10 = vadd.f32 %v126_v8, %v125_v6  ;;  %v133_v11 = vrot.slane %v132_v9, 2 }
  0x1c   : > { %v128_v12 = vrot.slane %v127_v10, 1  ;;  %v134_v13 = vadd.f32 %v133_v11, %v132_v9 }
  0x1e   : > { %v129_v14 = vadd.f32 %v128_v12, %v127_v10  ;;  %v135_v15 = vrot.slane %v134_v13, 1 }
  0x20   : > { %v136_v16 = vadd.f32 %v135_v15, %v134_v13  ;;  %v137_v17 = vadd.f32 1e-06, %v129_v14 }
  0x22   : > { %v138_v18 = vadd.f32 1e-06, %v136_v16  ;;  %223 = vrsqrt.f32 %v137_v17 }
  0x24   : > { %225 = vrsqrt.f32 %v138_v18 }
  0x2c   : > { %v224_v19 = vpop.eup %223 }
  0x2e   : > { %v226_v20 = vpop.eup %225 }
  0x2f   : > { %v143_v21 = vcombine.low %v224_v19, %v226_v20 }
  0x31   : > { %v145_v22 = vmul.f32 %v143_v21, %v117_v0 }
  0x33   : > { %146 = vst [vmem:[%s116_s14] sm:$0xff] %v145_v22 }
  0x34 PF: > { %s11_s6 = sadd.s32 1, %s233_s6  }
  0x35   : > { %p8_p4 = scmp.ge.s32.totalorder %s11_s6, 4  }
  0x37   :  { %10 = sbr.rel (!%p8_p4) target bundleno = 1 (0x1), region = 54 }

</bundles_post_ra>
